<compile_context>
chip_gen: v6e
topology: v6e:2x2x1
jax: 0.10.0
libtpu: 0.0.40
codegen_flags: <defaults>
</compile_context>

<pallas_src>
import functools

import jax
import jax.numpy as jnp
from jax import lax
from jax.experimental import pallas as pl
from jax.experimental.pallas import tpu as pltpu

EPS = 1e-5
_MiB = 1024 * 1024


# --------------------------------------------------------------------------------------
# Kernels
# --------------------------------------------------------------------------------------
def _fused_kernel(x_ref, gamma_ref, beta_ref, o_ref, *, inv_count):
    """Whole activation resident in VMEM: stats + normalize + categorical affine."""
    x = x_ref[...].astype(jnp.float32)                       # (N, C, HW)
    s_n = jnp.sum(x, axis=2, keepdims=True)                  # (N, C, 1)
    ss_n = jnp.sum(x * x, axis=2, keepdims=True)             # (N, C, 1)
    s = jnp.sum(s_n, axis=0, keepdims=True)                  # (1, C, 1)
    ss = jnp.sum(ss_n, axis=0, keepdims=True)                # (1, C, 1)
    mean = s * inv_count
    var = jnp.maximum(ss * inv_count - mean * mean, 0.0)
    inv_std = lax.rsqrt(var + EPS)                            # EUP
    scale = gamma_ref[...] * inv_std                          # (N, C, 1)
    shift = beta_ref[...] - mean * scale                      # (N, C, 1)
    o_ref[...] = (x * scale + shift).astype(o_ref.dtype)


def _stats_kernel(x_ref, psum_ref, psumsq_ref):
    """Per-(split, sample, channel-tile) partial sum / sum-of-squares over HW tiles."""
    @pl.when(pl.program_id(3) == 0)
    def _init():
        psum_ref[...] = jnp.zeros_like(psum_ref)
        psumsq_ref[...] = jnp.zeros_like(psumsq_ref)

    x = x_ref[...].astype(jnp.float32)                        # (1, c_tile, hw_tile)
    psum_ref[...] += jnp.sum(x, axis=2, keepdims=True)[None]      # (1, 1, c_tile, 1)
    psumsq_ref[...] += jnp.sum(x * x, axis=2, keepdims=True)[None]


def _apply_kernel(x_ref, scale_ref, shift_ref, o_ref):
    """Pure streaming apply: out = x * scale_n + shift_n (scale/shift precomputed)."""
    x = x_ref[...].astype(jnp.float32)                        # (1, c_tile, hw_tile)
    o_ref[...] = (x * scale_ref[...] + shift_ref[...]).astype(o_ref.dtype)


# --------------------------------------------------------------------------------------
# Sizing helpers (generation-aware)
# --------------------------------------------------------------------------------------
def _round_up(x, m):
    return (x + m - 1) // m * m


def _sublane_granule(dtype):
    itemsize = jnp.dtype(dtype).itemsize
    return max(8, 32 // itemsize)          # f32 -> 8, bf16 -> 16, int8/fp8 -> 32


def _padded_bytes(n, c, hw, dtype):
    gran = _sublane_granule(dtype)
    return n * _round_up(c, gran) * _round_up(hw, 128) * jnp.dtype(dtype).itemsize


def _tpu_vmem_capacity():
    """Physical VMEM bytes (64 MiB v7x, 128 MiB v5e/v6e); conservative fallback."""
    try:
        info = pltpu.get_tpu_info()
        cap = getattr(info, "vmem_capacity_bytes", None)
        if cap:
            return int(cap)
    except Exception:
        pass
    return 64 * _MiB


def _pick_tiles(C, HW, dtype, budget_bytes):
    """Pick (c_tile, hw_tile): lane-dense, legal, f32-padded block <= budget.

    hw_tile: multiple-of-128 divisor of HW, or the full extent HW (always legal).
    c_tile:  sublane-granule divisor of C, or the full extent C (always legal).
    Prefers the largest hw_tile (lane-dense stores), then the largest c_tile that fits.
    """
    gran = _sublane_granule(dtype)
    hw_cands = [t for t in range(HW, 0, -1) if t % 128 == 0 and HW % t == 0]
    if HW not in hw_cands:
        hw_cands.insert(0, HW)
    c_cands = [c for c in range(C, 0, -1) if c % gran == 0 and C % c == 0]
    if C not in c_cands:
        c_cands.insert(0, C)

    for hw_t in hw_cands:
        for c_t in c_cands:
            if _round_up(c_t, 8) * _round_up(hw_t, 128) * 4 <= budget_bytes:
                return c_t, hw_t
    return c_cands[-1], hw_cands[-1]       # best effort: smallest legal block


# --------------------------------------------------------------------------------------
# Wrapper
# --------------------------------------------------------------------------------------
def categorical_batch_norm(x_nchw, y, gamma_table, beta_table, *,
                           force_two_pass=False, hw_tile=None, c_tile=None):
    """x_nchw: (N, C, H, W); y: (N,) int; tables: (num_categories, C)."""
    N, C, H, W = x_nchw.shape
    HW = H * W
    x = x_nchw.reshape(N, C, HW)          # free: NCHW is already (N, C, HW)-contiguous
    dtype = x.dtype

    cap = _tpu_vmem_capacity()
    if cap <= 64 * _MiB:                   # v7x-class: 64 MiB physical VMEM
        tile_budget = 2 * _MiB
        vmem_limit = 48 * _MiB
    else:                                  # v5e / v6e: 128 MiB physical VMEM
        tile_budget = 6 * _MiB
        vmem_limit = min(int(0.75 * cap), 96 * _MiB)

    inv_count = 1.0 / float(N * HW)
    # Per-sample embedding lookup (tiny (N, C) gather; clamp so no OOB row is read).
    y_idx = jnp.clip(y.astype(jnp.int32), 0, gamma_table.shape[0] - 1)
    gamma_n = jnp.take(gamma_table, y_idx, axis=0).astype(jnp.float32)[..., None]  # (N,C,1)
    beta_n = jnp.take(beta_table, y_idx, axis=0).astype(jnp.float32)[..., None]    # (N,C,1)

    # ---- Fused fast path: x resident in VMEM -> one HBM read + one HBM write --------
    fused_needed = (2 * _padded_bytes(N, C, HW, dtype)
                    + 2 * _padded_bytes(N, C, HW, jnp.float32)
                    + 1 * _MiB)
    if (not force_two_pass) and fused_needed <= int(0.55 * cap):
        fused_limit = int(min(0.85 * cap, max(fused_needed + 8 * _MiB, 16 * _MiB)))
        out = pl.pallas_call(
            functools.partial(_fused_kernel, inv_count=inv_count),
            out_shape=jax.ShapeDtypeStruct((N, C, HW), dtype),
            compiler_params=pltpu.CompilerParams(vmem_limit_bytes=fused_limit),
        )(x, gamma_n, beta_n)
        return out.reshape(N, C, H, W)

    # ---- Two-pass path ---------------------------------------------------------------
    if hw_tile is None or c_tile is None:
        auto_c, auto_hw = _pick_tiles(C, HW, dtype, tile_budget)
        if c_tile is None:
            c_tile = auto_c
        if hw_tile is None:
            hw_tile = auto_hw
    assert HW % hw_tile == 0, (HW, hw_tile)
    assert C % c_tile == 0, (C, c_tile)

    n_hw = HW // hw_tile
    n_c = C // c_tile
    # 2-way split of the HW-tile axis so both v7x TensorCores get pass-1 work even
    # when N is small/odd (megacore shards the leading "parallel" axes).
    split = 2 if (n_hw >= 2 and n_hw % 2 == 0) else 1
    j_per = n_hw // split

    # Pass 1: partial sums / sums-of-squares (reads x exactly once).
    psum, psumsq = pl.pallas_call(
        _stats_kernel,
        out_shape=(jax.ShapeDtypeStruct((split, N, C, 1), jnp.float32),
                   jax.ShapeDtypeStruct((split, N, C, 1), jnp.float32)),
        grid=(split, N, n_c, j_per),
        in_specs=[pl.BlockSpec((1, c_tile, hw_tile),
                               lambda s, i, c, j: (i, c, s * j_per + j))],
        out_specs=(pl.BlockSpec((1, 1, c_tile, 1), lambda s, i, c, j: (s, i, c, 0)),
                   pl.BlockSpec((1, 1, c_tile, 1), lambda s, i, c, j: (s, i, c, 0))),
        compiler_params=pltpu.CompilerParams(
            dimension_semantics=("parallel", "parallel", "parallel", "arbitrary"),
            vmem_limit_bytes=vmem_limit),
    )(x)

    # Tiny wrapper glue: fold partials, derive per-sample scale/shift ((N, C) math only).
    sum_c = jnp.sum(psum, axis=(0, 1))                 # (C, 1)
    sumsq_c = jnp.sum(psumsq, axis=(0, 1))             # (C, 1)
    mean = sum_c * inv_count
    var = jnp.maximum(sumsq_c * inv_count - mean * mean, 0.0)
    inv_std = lax.rsqrt(var + EPS)                     # (C, 1)
    scale_n = gamma_n * inv_std[None]                  # (N, C, 1)
    shift_n = beta_n - mean[None] * scale_n            # (N, C, 1)

    # Pass 2: pure streaming normalize+affine; large HW axis leads for balanced 2-TC split.
    out = pl.pallas_call(
        _apply_kernel,
        out_shape=jax.ShapeDtypeStruct((N, C, HW), dtype),
        grid=(n_hw, N, n_c),
        in_specs=[
            pl.BlockSpec((1, c_tile, hw_tile), lambda j, i, c: (i, c, j)),   # x tile
            pl.BlockSpec((1, c_tile, 1), lambda j, i, c: (i, c, 0)),         # scale_n
            pl.BlockSpec((1, c_tile, 1), lambda j, i, c: (i, c, 0)),         # shift_n
        ],
        out_specs=pl.BlockSpec((1, c_tile, hw_tile), lambda j, i, c: (i, c, j)),
        compiler_params=pltpu.CompilerParams(
            dimension_semantics=("parallel", "parallel", "parallel"),
            vmem_limit_bytes=vmem_limit),
    )(x, scale_n, shift_n)

    return out.reshape(N, C, H, W)


# --------------------------------------------------------------------------------------
# Test
# --------------------------------------------------------------------------------------
def _reference(x, y, gamma_table, beta_table):
    mean = x.mean(axis=(0, 2, 3), keepdims=True)
    var = ((x - mean) ** 2).mean(axis=(0, 2, 3), keepdims=True)
    ret = (x - mean) / jnp.sqrt(var + EPS)
    return gamma_table[y][:, :, None, None] * ret + beta_table[y][:, :, None, None]


if __name__ == "__main__":
    key = jax.random.PRNGKey(0)
    num_categories = 10

    # --- Case 1: small, 128-divisible spatial; exercises fused path AND tiled two-pass.
    N, C, H, W = 2, 4, 16, 16
    k1, k2, k3, k4, key = jax.random.split(key, 5)
    x1 = jax.random.normal(k1, (N, C, H, W), dtype=jnp.float32)
    y1 = jax.random.randint(k2, (N,), 0, num_categories, dtype=jnp.int32)
    # Module __init__ sets gamma_c.weight=1, beta_c.weight=0; perturb so the categorical
    # affine path is actually exercised numerically.
    g1 = 1.0 + 0.1 * jax.random.normal(k3, (num_categories, C), jnp.float32)
    b1 = 0.1 * jax.random.normal(k4, (num_categories, C), jnp.float32)
    ref1 = _reference(x1, y1, g1, b1)

    out_fused = categorical_batch_norm(x1, y1, g1, b1)                       # fused path
    jax.block_until_ready(out_fused)
    err_f = float(jnp.max(jnp.abs(out_fused - ref1)))
    assert out_fused.shape == (N, C, H, W)
    assert jnp.allclose(out_fused, ref1, atol=1e-4), ("fused", err_f)

    out_tiled = categorical_batch_norm(x1, y1, g1, b1,                       # two-pass,
                                       force_two_pass=True, hw_tile=128)     # split=2
    jax.block_until_ready(out_tiled)
    err_t = float(jnp.max(jnp.abs(out_tiled - ref1)))
    assert jnp.allclose(out_tiled, ref1, atol=1e-4), ("two_pass", err_t)

    # --- Case 2: non-128-divisible spatial (HW = 14*14 = 196); hardened tile picker.
    N2, C2, H2, W2 = 2, 8, 14, 14
    k5, k6, k7, k8, key = jax.random.split(key, 5)
    x2 = jax.random.normal(k5, (N2, C2, H2, W2), dtype=jnp.float32)
    y2 = jax.random.randint(k6, (N2,), 0, num_categories, dtype=jnp.int32)
    g2 = 1.0 + 0.1 * jax.random.normal(k7, (num_categories, C2), jnp.float32)
    b2 = 0.1 * jax.random.normal(k8, (num_categories, C2), jnp.float32)
    ref2 = _reference(x2, y2, g2, b2)

    out2 = categorical_batch_norm(x2, y2, g2, b2, force_two_pass=True)
    jax.block_until_ready(out2)
    err2 = float(jnp.max(jnp.abs(out2 - ref2)))
    assert out2.shape == (N2, C2, H2, W2)
    assert jnp.allclose(out2, ref2, atol=1e-4), ("ragged_hw", err2)

    print("KERNEL_OK")
</pallas_src>

<mosaic_0001>
module attributes {stable_mosaic.version = 11 : i64} {
  func.func @_fused_kernel(%arg0: memref<2x4x256xf32, #tpu.memory_space<vmem>>, %arg1: memref<2x4x1xf32, #tpu.memory_space<vmem>>, %arg2: memref<2x4x1xf32, #tpu.memory_space<vmem>>, %arg3: memref<2x4x256xf32, #tpu.memory_space<vmem>>) attributes {dimension_semantics = [], scalar_prefetch = 0 : i64, scratch_operands = 0 : i64, tpu.core_type = #tpu.core_type<tc>} {
    %c0 = arith.constant 0 : index
    %c0_0 = arith.constant 0 : index
    %c0_1 = arith.constant 0 : index
    %0 = vector.load %arg0[%c0, %c0_0, %c0_1] : memref<2x4x256xf32, #tpu.memory_space<vmem>>, vector<2x4x256xf32>
    %cst = arith.constant dense<0.000000e+00> : vector<2x4xf32>
    %1 = vector.multi_reduction <add>, %0, %cst [2] : vector<2x4x256xf32> to vector<2x4xf32>
    %2 = vector.shape_cast %1 : vector<2x4xf32> to vector<2x4x1xf32>
    %3 = arith.mulf %0, %0 : vector<2x4x256xf32>
    %cst_2 = arith.constant dense<0.000000e+00> : vector<2x4xf32>
    %4 = vector.multi_reduction <add>, %3, %cst_2 [2] : vector<2x4x256xf32> to vector<2x4xf32>
    %5 = vector.shape_cast %4 : vector<2x4xf32> to vector<2x4x1xf32>
    %cst_3 = arith.constant dense<0.000000e+00> : vector<4x1xf32>
    %6 = vector.multi_reduction <add>, %2, %cst_3 [0] : vector<2x4x1xf32> to vector<4x1xf32>
    %7 = vector.shape_cast %6 : vector<4x1xf32> to vector<1x4x1xf32>
    %cst_4 = arith.constant dense<0.000000e+00> : vector<4x1xf32>
    %8 = vector.multi_reduction <add>, %5, %cst_4 [0] : vector<2x4x1xf32> to vector<4x1xf32>
    %9 = vector.shape_cast %8 : vector<4x1xf32> to vector<1x4x1xf32>
    %cst_5 = arith.constant 0.001953125 : f32
    %10 = vector.broadcast %cst_5 : f32 to vector<1x4x1xf32>
    %11 = arith.mulf %7, %10 : vector<1x4x1xf32>
    %cst_6 = arith.constant 0.001953125 : f32
    %12 = vector.broadcast %cst_6 : f32 to vector<1x4x1xf32>
    %13 = arith.mulf %9, %12 : vector<1x4x1xf32>
    %14 = arith.mulf %11, %11 : vector<1x4x1xf32>
    %15 = arith.subf %13, %14 : vector<1x4x1xf32>
    %cst_7 = arith.constant 0.000000e+00 : f32
    %16 = vector.broadcast %cst_7 : f32 to vector<1x4x1xf32>
    %17 = arith.maximumf %15, %16 : vector<1x4x1xf32>
    %cst_8 = arith.constant 9.99999974E-6 : f32
    %18 = vector.broadcast %cst_8 : f32 to vector<1x4x1xf32>
    %19 = arith.addf %17, %18 : vector<1x4x1xf32>
    %20 = math.rsqrt %19 : vector<1x4x1xf32>
    %c0_9 = arith.constant 0 : index
    %c0_10 = arith.constant 0 : index
    %c0_11 = arith.constant 0 : index
    %21 = vector.load %arg1[%c0_9, %c0_10, %c0_11] : memref<2x4x1xf32, #tpu.memory_space<vmem>>, vector<2x4x1xf32>
    %22 = vector.broadcast %20 : vector<1x4x1xf32> to vector<2x4x1xf32>
    %23 = arith.mulf %21, %22 : vector<2x4x1xf32>
    %c0_12 = arith.constant 0 : index
    %c0_13 = arith.constant 0 : index
    %c0_14 = arith.constant 0 : index
    %24 = vector.load %arg2[%c0_12, %c0_13, %c0_14] : memref<2x4x1xf32, #tpu.memory_space<vmem>>, vector<2x4x1xf32>
    %25 = vector.broadcast %11 : vector<1x4x1xf32> to vector<2x4x1xf32>
    %26 = arith.mulf %25, %23 : vector<2x4x1xf32>
    %27 = arith.subf %24, %26 : vector<2x4x1xf32>
    %28 = vector.broadcast %23 : vector<2x4x1xf32> to vector<2x4x256xf32>
    %29 = arith.mulf %0, %28 : vector<2x4x256xf32>
    %30 = vector.broadcast %27 : vector<2x4x1xf32> to vector<2x4x256xf32>
    %31 = arith.addf %29, %30 : vector<2x4x256xf32>
    %c0_15 = arith.constant 0 : index
    %c0_16 = arith.constant 0 : index
    %c0_17 = arith.constant 0 : index
    %32 = vector.load %arg3[%c0_15, %c0_16, %c0_17] : memref<2x4x256xf32, #tpu.memory_space<vmem>>, vector<2x4x256xf32>
    tpu.vector_store %arg3[%c0_15, %c0_16, %c0_17], %31 {strides = array<i32>} : memref<2x4x256xf32, #tpu.memory_space<vmem>>, vector<2x4x256xf32>,
    return
  }
}

</mosaic_0001>

<bundles_post_ra>
// kernel: tpu_custom_call.1
= control target key start
LH: loop header
LB: loop body
LE: loop exit
PB: predicated region body
PF: predicated region fallthrough
CT: control target
= control target key end

     0   :  { %vm23_vm0 = vcmask 1043456   ;;  %s252_s0 = inlined_call_operand.vmem [shape: f32[2,4,256], index: 0, kind: input, shape index: {}]   ;;  %s253_s1 = inlined_call_operand.vmem [shape: f32[2,4,1], index: 1, kind: input, shape index: {}]   ;;  %s254_s2 = inlined_call_operand.vmem [shape: f32[2,4,1], index: 2, kind: input, shape index: {}]   ;;  %s255_s3 = inlined_call_operand.hbm [shape: f32[2,4,256], index: 3, kind: output, shape index: {}]  }
   0x1   :  { %v206_v0 = vld [vmem:[%s252_s0] sm:$0xff]  ;;  %v211_v1 = vld [vmem:[%s252_s0 + $0x8] sm:$0xff] }
   0x2   :  { %8 = vsyncpa [#allocation3], 0  ;;  %v19_v2 = vcombine.high %v206_v0, %v206_v0  ;;  %v24_v3 = vsel %vm23_vm0, %v206_v0, 0.0  ;;  %v34_v4 = vmul.f32 %v206_v0, %v206_v0  ;;  %v20_v5 = vcombine.high %v211_v1, %v211_v1  ;;  %v66_v37 = vld [vmem:[%s253_s1 + $0x4] sm:$0xf] }
   0x3   :  { %v29_v6 = vsel %vm23_vm0, %v211_v1, 0.0  ;;  %v35_v7 = vmul.f32 %v211_v1, %v211_v1  ;;  %v178_v20 = vmov 0   ;;  %v65_v38 = vld [vmem:[%s253_s1] sm:$0xf]  ;;  %v70_v46 = vld [vmem:[%s254_s2 + $0x4] sm:$0xf]  ;;  %v86_v50 = vlaneseq }
   0x4   :  { %v25_v8 = vsel %vm23_vm0, %v19_v2, 0.0  ;;  %v38_v9 = vcombine.high %v34_v4, %v34_v4  ;;  %v42_v10 = vsel %vm23_vm0, %v34_v4, 0.0  ;;  %v30_v11 = vsel %vm23_vm0, %v20_v5, 0.0  ;;  %151 = vset.pattern.permute.xlu1 %v178_v20  ;;  %150 = vset.pattern.permute.xlu0 %v178_v20  ;;  %v69_v42 = vld [vmem:[%s254_s2] sm:$0xf]  ;;  %s180_s1 = smov [#allocation2]  }
   0x5   :  { %v26_v12 = vadd.f32 %v25_v8, %v24_v3  ;;  %v39_v13 = vcombine.high %v35_v7, %v35_v7  ;;  %v47_v15 = vsel %vm23_vm0, %v35_v7, 0.0  ;;  %v31_v17 = vadd.f32 %v30_v11, %v29_v6  ;;  %s134_s2 = sshll.u32 %s180_s1, 4  ;;  %s135_s2 = int_to_ptr.vmem [resolvable:$true] %s134_s2 }
   0x6   :  { %v43_v14 = vsel %vm23_vm0, %v38_v9, 0.0  ;;  %v179_v48 = vmov 839922192   ;;  %v87_v52 = vshrl.u32 %v86_v50, 7  ;;  %s156_s23 = scalar_lea.vmem %s135_s2, 256  ;;  %p161_p1 = scmp.lt.s32.totalorder %s135_s2, %s135_s2 }
   0x7   :  { %27 = vadd.xlane.f32.xlu0 %v26_v12  ;;  %v44_v16 = vadd.f32 %v43_v14, %v42_v10  ;;  %v48_v18 = vsel %vm23_vm0, %v39_v13, 0.0  ;;  %v84_v49 = vunpack.c.l.s4 %v179_v48  ;;  %p157_p0 = scmp.ne.s32.totalorder %s135_s2, %s156_s23  ;;  %p162_p2 = scmp.lt.s32.totalorder %s156_s23, %s156_s23 }
   0x8   :  { %v49_v19 = vadd.f32 %v48_v18, %v47_v15 }
   0x9   :  { %45 = vadd.xlane.f32.xlu1 %v44_v16  ;;  %v85_v51 = vunpack.c.0.s8 %v84_v49  ;;  %p163_p3 = por %p162_p2, %p161_p1 }
   0xb   :  { %32 = vadd.xlane.f32.xlu0 %v31_v17  ;;  %v88_v53 = vsub.s32 %v85_v51, %v87_v52  ;;  %p164_p4 = pnand %p163_p3, %p157_p0 }
   0xd   :  { %50 = vadd.xlane.f32.xlu1 %v49_v19 }
  0x90   :  { %v28_v21 = vpop.xlane.xlu0 %27 }
  0x91   :  { %v52_v24 = vsel %vm23_vm0, %v28_v21, 0.0 }
  0x92   :  { %v46_v22 = vpop.xlane.xlu1 %45 }
  0x93   :  { %v55_v28 = vsel %vm23_vm0, %v46_v22, 0.0 }
  0x94   :  { %v33_v23 = vpop.xlane.xlu0 %32 }
  0x95   :  { %v53_v25 = vsel %vm23_vm0, %v33_v23, 0.0 }
  0x96   :  { %v54_v26 = vadd.f32 %v53_v25, %v52_v24  ;;  %v51_v27 = vpop.xlane.xlu1 %50 }
  0x97   :  { %v56_v29 = vsel %vm23_vm0, %v51_v27, 0.0 }
  0x98   :  { %v58_v30 = vmul.f32 0.001953125, %v54_v26  ;;  %v57_v31 = vadd.f32 %v56_v29, %v55_v28 }
  0x9a   :  { %v59_v32 = vmul.f32 0.001953125, %v57_v31  ;;  %v60_v33 = vmul.f32 %v58_v30, %v58_v30 }
  0x9c   :  { %v61_v34 = vsub.f32 %v59_v32, %v60_v33 }
  0x9e   :  { %v62_v35 = vmax.f32 %v61_v34, 0.0 }
  0xa0   :  { %v63_v36 = vadd.f32 1e-05, %v62_v35 }
  0xa2   :  { %154 = vrsqrt.f32 %v63_v36 }
  0xaf   :  { %v155_v39 = vpop.eup %154 }
  0xb0   :  { %v68_v40 = vmul.f32 %v155_v39, %v66_v37  ;;  %v67_v41 = vmul.f32 %v155_v39, %v65_v38 }
  0xb2   :  { %81 = vperm.xlu1 %151, %v68_v40   ;;  %77 = vperm.xlu0 %150, %v67_v41   ;;  %v71_v43 = vmul.f32 %v67_v41, %v58_v30  ;;  %v72_v45 = vmul.f32 %v68_v40, %v58_v30 }
  0xb4   :  { %v73_v44 = vsub.f32 %v69_v42, %v71_v43  ;;  %v74_v47 = vsub.f32 %v70_v46, %v72_v45 }
  0xb6   :  { %103 = vperm.xlu1 %151, %v73_v44  }
  0xba   :  { %107 = vperm.xlu1 %151, %v74_v47  }
 0x12d   :  { %v82_v54 = vpop.permute.xlu1 %81  ;;  %v78_v55 = vpop.permute.xlu0 %77 }
 0x12e   :  { %v89_v56 = vrot.slane %v78_v55, %v88_v53  ;;  %v96_v58 = vrot.slane %v82_v54, %v88_v53 }
 0x130   :  { %v99_v59 = vmul.f32 %v89_v56, %v206_v0  ;;  %v100_v63 = vmul.f32 %v96_v58, %v211_v1 }
 0x131   :  { %v104_v57 = vpop.permute.xlu1 %103 }
 0x132   :  { %v115_v60 = vrot.slane %v104_v57, %v88_v53 }
 0x134   :  { %v125_v61 = vadd.f32 %v115_v60, %v99_v59 }
 0x135   :  { %v108_v62 = vpop.permute.xlu1 %107 }
 0x136   :  { %127 = vst [vmem:[#allocation2] sm:$0xff] %v125_v61  ;;  %v122_v2 = vrot.slane %v108_v62, %v88_v53 }
 0x138   :  { %v126_v3 = vadd.f32 %v122_v2, %v100_v63 }
 0x13a   :  { %128 = vst [vmem:[#allocation2 + $0x8] sm:$0xff] %v126_v3 }
 0x13b   :  { %167 = shalt.err (!%p164_p4)
}
 0x13c   :  { %s181_s24 = smov 128   ;;  %s182_s25 = smov 8  }
 0x13d   :  { %140 = dma.vmem_to_hbm [thread:$0]  %s135_s2, 256, %s255_s3, [#allocation3], %s181_s24, %s181_s24, %s182_s25  }
 0x13e   :  { %176 = dma.done.wait [#allocation3], 256  }
 0x13f   :  { %177 = vsyncadd [#allocation3], 4294967040 }
 0x140   :  { %144 = vsyncpa [#allocation3], 1 }

</bundles_post_ra>
